<compile_context>
chip_gen: v6e
topology: v6e:2x2x1
jax: 0.10.0
libtpu: 0.0.40
codegen_flags: <defaults>
</compile_context>

<pallas_src>
import math

import jax
import jax.numpy as jnp
from jax.experimental import pallas as pl
from jax.experimental.pallas import tpu as pltpu


def _round_up(x: int, m: int) -> int:
    return ((x + m - 1) // m) * m


def _vmem_capacity_bytes() -> int:
    try:
        return int(pltpu.get_tpu_info().vmem_capacity_bytes)
    except Exception:
        return 64 * 1024 * 1024  # conservative fallback (v7x per-TC VMEM)


def _largest_divisor_tile(total: int, target: int, unit: int = 128) -> int:
    """Largest multiple of `unit` that divides `total` and is <= target."""
    n = total // unit
    tgt = max(1, target // unit)
    best = 1
    for d in range(1, n + 1):
        if n % d == 0 and d <= tgt:
            best = d
    return best * unit


def _vmem_bytes(tr, tf, dmp, esize, out_esize, single_step):
    b = 2 * tr * dmp * esize            # x tile (double buffered)
    b += 2 * tr * dmp * out_esize       # out tile
    b += 2 * dmp * tf * esize           # W1^T block (x2: conservative)
    b += 2 * tf * dmp * esize           # W2^T block
    b += 2 * (tf + dmp) * 4             # biases
    b += tr * tf * 4                    # f32 ReLU intermediate
    if not single_step:
        b += tr * dmp * 4               # f32 accumulator scratch
    return b


# ----------------------------------------------------------------------------
# Kernels
# ----------------------------------------------------------------------------

def _ffn_fused_kernel(x_ref, w1t_ref, b1_ref, w2t_ref, b2_ref, o_ref):
    # Single k step: weights resident in VMEM, no scratch accumulator.
    h = jnp.dot(x_ref[...], w1t_ref[...], preferred_element_type=jnp.float32)
    h = jnp.maximum(h + b1_ref[...], 0.0)
    o = jnp.dot(h.astype(w2t_ref.dtype), w2t_ref[...],
                preferred_element_type=jnp.float32)
    o_ref[...] = (o + b2_ref[...]).astype(o_ref.dtype)


def _ffn_acc_kernel(x_ref, w1t_ref, b1_ref, w2t_ref, b2_ref, o_ref, acc_ref):
    # d_ff tiled as a reduction ("arbitrary") axis with f32 accumulator.
    k = pl.program_id(1)

    @pl.when(k == 0)
    def _():
        acc_ref[...] = jnp.zeros_like(acc_ref)

    h = jnp.dot(x_ref[...], w1t_ref[...], preferred_element_type=jnp.float32)
    h = jnp.maximum(h + b1_ref[...], 0.0)  # ReLU is elementwise over d_ff -> exact per-chunk
    acc_ref[...] += jnp.dot(h.astype(w2t_ref.dtype), w2t_ref[...],
                            preferred_element_type=jnp.float32)

    @pl.when(k == pl.num_programs(1) - 1)
    def _():
        o_ref[...] = (acc_ref[...] + b2_ref[...]).astype(o_ref.dtype)


# ----------------------------------------------------------------------------
# Host-side wrappers
# ----------------------------------------------------------------------------

def prepare_ffn_params(w1, b1, w2, b2, *, compute_dtype=jnp.bfloat16):
    """Transpose/pad/cast weights once; reuse the result across calls.

    w1: (d_ff, d_model), b1: (d_ff,)      -- nn.Linear(d_model, d_ff)
    w2: (d_model, d_ff), b2: (d_model,)   -- nn.Linear(d_ff, d_model)
    """
    d_ff, d_model = w1.shape
    d_model_p = _round_up(d_model, 128)
    d_ff_p = _round_up(d_ff, 128)

    w1t = jnp.zeros((d_model_p, d_ff_p), compute_dtype).at[:d_model, :d_ff].set(
        w1.T.astype(compute_dtype))
    w2t = jnp.zeros((d_ff_p, d_model_p), compute_dtype).at[:d_ff, :d_model].set(
        w2.T.astype(compute_dtype))
    b1r = jnp.zeros((1, d_ff_p), jnp.float32).at[:, :d_ff].set(
        b1.reshape(1, d_ff).astype(jnp.float32))
    b2r = jnp.zeros((1, d_model_p), jnp.float32).at[:, :d_model].set(
        b2.reshape(1, d_model).astype(jnp.float32))

    return {"w1t": w1t, "b1r": b1r, "w2t": w2t, "b2r": b2r,
            "d_model": d_model, "d_ff": d_ff, "compute_dtype": compute_dtype}


def feed_forward(x, w1=None, b1=None, w2=None, b2=None, *, params=None,
                 compute_dtype=jnp.bfloat16, tile_rows=None, tile_ff=None):
    """Matches PyTorch FeedForward.forward: relu(x @ w1.T + b1) @ w2.T + b2."""
    if params is None:
        params = prepare_ffn_params(w1, b1, w2, b2, compute_dtype=compute_dtype)
    compute_dtype = params["compute_dtype"]
    w1t, b1r, w2t, b2r = params["w1t"], params["b1r"], params["w2t"], params["b2r"]
    d_model, d_ff = params["d_model"], params["d_ff"]
    d_model_p, d_ff_p = w1t.shape

    orig_shape = x.shape
    assert orig_shape[-1] == d_model, "x last dim must equal d_model"
    rows = math.prod(orig_shape[:-1])          # host-side shape math
    out_dtype = x.dtype
    esize = jnp.dtype(compute_dtype).itemsize
    out_esize = jnp.dtype(out_dtype).itemsize

    # --------------------------- schedule selection ---------------------------
    vmem_cap = _vmem_capacity_bytes()
    budget = int(vmem_cap * 0.72)              # leave headroom for internal scratch
    big_vmem = vmem_cap >= (96 << 20)          # v5e/v6e: 128 MiB; v7x: 64 MiB

    # tile_ff: prefer full-d_ff weight residency (weights DMA'd once, k-loop gone)
    if tile_ff is None:
        weight_pair = 2 * d_model_p * d_ff_p * esize       # W1^T + W2^T bytes
        if 2 * weight_pair <= int(0.6 * budget):           # x2: conservative
            tile_ff = d_ff_p
        else:
            tile_ff = _largest_divisor_tile(d_ff_p, 1024 if big_vmem else 512)
    else:
        tile_ff = _largest_divisor_tile(d_ff_p, max(128, tile_ff))

    # tile_rows: as large as the budget allows; multiple of 16 (bf16 sublanes)
    if tile_rows is None:
        tile_rows = min(1024 if big_vmem else 512, _round_up(rows, 16))
        # Guarantee >=2 row blocks so v7x's second TensorCore gets work.
        if rows >= 32:
            tile_rows = min(tile_rows, _round_up(-(-rows // 2), 16))
    else:
        tile_rows = max(16, _round_up(tile_rows, 16))

    def _fits(tr, tf):
        return _vmem_bytes(tr, tf, d_model_p, esize, out_esize, tf == d_ff_p) <= budget

    while tile_rows > 16 and not _fits(tile_rows, tile_ff):
        tile_rows = max(16, _round_up(tile_rows // 2, 16))
    while tile_ff > 128 and not _fits(tile_rows, tile_ff):
        tile_ff = _largest_divisor_tile(d_ff_p, tile_ff // 2)
    # TODO(synk): for very large d_model, tile the output d_model dimension
    # instead of only shrinking tile_rows (v7x 64 MiB VMEM case).

    single_step = (tile_ff == d_ff_p)
    rows_p = _round_up(max(rows, tile_rows), tile_rows)
    num_row_tiles = rows_p // tile_rows

    # --------------------------- activation prep -----------------------------
    x2d = x.reshape(rows, d_model)
    if x2d.dtype != compute_dtype:
        x2d = x2d.astype(compute_dtype)
    if rows_p != rows or d_model_p != d_model:
        x2d = jnp.zeros((rows_p, d_model_p), compute_dtype).at[:rows, :d_model].set(x2d)

    # --------------------------- VMEM limit / cost ---------------------------
    vmem_bytes = _vmem_bytes(tile_rows, tile_ff, d_model_p, esize, out_esize,
                             single_step)
    vmem_limit = int(min(max(int(1.3 * vmem_bytes) + (2 << 20), 32 << 20),
                         vmem_cap - (2 << 20)))

    weight_stream = 1 if single_step else num_row_tiles
    cost = pl.CostEstimate(
        flops=4 * rows_p * d_model_p * d_ff_p,          # two matmuls
        transcendentals=0,
        bytes_accessed=int(
            rows_p * d_model_p * (esize + out_esize)                  # x in, out
            + weight_stream * (w1t.size + w2t.size) * esize           # weights
            + weight_stream * b1r.size * 4 + b2r.size * 4))           # biases

    # --------------------------- pallas_call ---------------------------------
    if single_step:
        out = pl.pallas_call(
            _ffn_fused_kernel,
            out_shape=jax.ShapeDtypeStruct((rows_p, d_model_p), out_dtype),
            grid_spec=pltpu.PrefetchScalarGridSpec(
                num_scalar_prefetch=0,
                grid=(num_row_tiles,),
                in_specs=[
                    pl.BlockSpec((tile_rows, d_model_p), lambda i: (i, 0)),  # x
                    pl.BlockSpec((d_model_p, d_ff_p), lambda i: (0, 0)),     # W1^T (resident)
                    pl.BlockSpec((1, d_ff_p), lambda i: (0, 0)),             # b1
                    pl.BlockSpec((d_ff_p, d_model_p), lambda i: (0, 0)),     # W2^T (resident)
                    pl.BlockSpec((1, d_model_p), lambda i: (0, 0)),          # b2
                ],
                out_specs=pl.BlockSpec((tile_rows, d_model_p), lambda i: (i, 0)),
            ),
            compiler_params=pltpu.CompilerParams(
                dimension_semantics=("parallel",),
                vmem_limit_bytes=vmem_limit),
            cost_estimate=cost,
        )(x2d, w1t, b1r, w2t, b2r)
    else:
        out = pl.pallas_call(
            _ffn_acc_kernel,
            out_shape=jax.ShapeDtypeStruct((rows_p, d_model_p), out_dtype),
            grid_spec=pltpu.PrefetchScalarGridSpec(
                num_scalar_prefetch=0,
                grid=(num_row_tiles, d_ff_p // tile_ff),
                in_specs=[
                    pl.BlockSpec((tile_rows, d_model_p), lambda i, k: (i, 0)),  # x
                    pl.BlockSpec((d_model_p, tile_ff), lambda i, k: (0, k)),    # W1^T block
                    pl.BlockSpec((1, tile_ff), lambda i, k: (0, k)),            # b1 block
                    pl.BlockSpec((tile_ff, d_model_p), lambda i, k: (k, 0)),    # W2^T block
                    pl.BlockSpec((1, d_model_p), lambda i, k: (0, 0)),          # b2
                ],
                out_specs=pl.BlockSpec((tile_rows, d_model_p), lambda i, k: (i, 0)),
                scratch_shapes=[pltpu.VMEM((tile_rows, d_model_p), jnp.float32)],
            ),
            compiler_params=pltpu.CompilerParams(
                dimension_semantics=("parallel", "arbitrary"),
                vmem_limit_bytes=vmem_limit),
            cost_estimate=cost,
        )(x2d, w1t, b1r, w2t, b2r)

    return out[:rows, :d_model].reshape(orig_shape)


# ----------------------------------------------------------------------------
# Self-test
# ----------------------------------------------------------------------------

if __name__ == "__main__":
    key = jax.random.PRNGKey(0)

    # Small shapes consistent with the module (d_ff default = 1024).
    B, S, d_model, d_ff = 2, 8, 32, 1024

    k1, k2, k3, k4, k5 = jax.random.split(key, 5)
    x = jax.random.normal(k1, (B, S, d_model), dtype=jnp.float32)
    w1 = jax.random.normal(k2, (d_ff, d_model), dtype=jnp.float32) / math.sqrt(d_model)
    b1 = jax.random.normal(k3, (d_ff,), dtype=jnp.float32) * 0.01
    w2 = jax.random.normal(k4, (d_model, d_ff), dtype=jnp.float32) / math.sqrt(d_ff)
    b2 = jax.random.normal(k5, (d_model,), dtype=jnp.float32) * 0.01

    def reference(xx):
        h = jnp.maximum(
            jnp.dot(xx, w1.T, precision=jax.lax.Precision.HIGHEST) + b1, 0.0)
        return jnp.dot(h, w2.T, precision=jax.lax.Precision.HIGHEST) + b2

    ref = reference(x)

    # f32 compute path: tight check against the high-precision reference.
    p_f32 = prepare_ffn_params(w1, b1, w2, b2, compute_dtype=jnp.float32)
    out_f32 = jax.block_until_ready(feed_forward(x, params=p_f32))
    assert out_f32.shape == (B, S, d_model)
    assert jnp.allclose(out_f32, ref, atol=5e-3, rtol=5e-3), "f32 path mismatch"

    # Default bf16 MXU path: params prepared once, reused across calls.
    p_bf16 = prepare_ffn_params(w1, b1, w2, b2, compute_dtype=jnp.bfloat16)
    out_bf16 = jax.block_until_ready(feed_forward(x, params=p_bf16))
    out_bf16_again = jax.block_until_ready(feed_forward(x, params=p_bf16))
    assert out_bf16.shape == (B, S, d_model)
    assert jnp.allclose(out_bf16, ref, atol=6e-2, rtol=6e-2), "bf16 path mismatch"
    assert jnp.allclose(out_bf16, out_bf16_again), "non-deterministic result"

    print("KERNEL_OK")
</pallas_src>

<mosaic_0001>
module attributes {stable_mosaic.version = 11 : i64} {
  func.func @_ffn_fused_kernel(%arg0: i32, %arg1: memref<16x128xf32, #tpu.memory_space<vmem>>, %arg2: memref<128x1024xf32, #tpu.memory_space<vmem>>, %arg3: memref<1x1024xf32, #tpu.memory_space<vmem>>, %arg4: memref<1024x128xf32, #tpu.memory_space<vmem>>, %arg5: memref<1x128xf32, #tpu.memory_space<vmem>>, %arg6: memref<16x128xf32, #tpu.memory_space<vmem>>) attributes {dimension_semantics = [#tpu.dimension_semantics<parallel>], iteration_bounds = array<i64: 1>, scalar_prefetch = 0 : i64, scratch_operands = 0 : i64, tpu.core_type = #tpu.core_type<tc>, window_params = [{transform_indices = @transform_0, window_bounds = array<i64: 16, 128>}, {pipeline_mode = #tpu.pipeline_mode<synchronous>, transform_indices = @transform_1, window_bounds = array<i64: 128, 1024>}, {pipeline_mode = #tpu.pipeline_mode<synchronous>, transform_indices = @transform_2, window_bounds = array<i64: 1, 1024>}, {pipeline_mode = #tpu.pipeline_mode<synchronous>, transform_indices = @transform_3, window_bounds = array<i64: 1024, 128>}, {pipeline_mode = #tpu.pipeline_mode<synchronous>, transform_indices = @transform_4, window_bounds = array<i64: 1, 128>}, {transform_indices = @transform_5, window_bounds = array<i64: 16, 128>}]} {
    %c0 = arith.constant 0 : index
    %c0_0 = arith.constant 0 : index
    %0 = vector.load %arg1[%c0, %c0_0] : memref<16x128xf32, #tpu.memory_space<vmem>>, vector<16x128xf32>
    %c0_1 = arith.constant 0 : index
    %c0_2 = arith.constant 0 : index
    %1 = vector.load %arg2[%c0_1, %c0_2] : memref<128x1024xf32, #tpu.memory_space<vmem>>, vector<128x1024xf32>
    %cst = arith.constant dense<0.000000e+00> : vector<16x1024xf32>
    %2 = tpu.matmul %0, %1, %cst {dimension_numbers = #tpu.dot_dimension_numbers<[1], [0], [0], [1], [0, 0, 1, 1], [], []>} : vector<16x128xf32>, vector<128x1024xf32>, vector<16x1024xf32> -> vector<16x1024xf32>
    %c0_3 = arith.constant 0 : index
    %c0_4 = arith.constant 0 : index
    %3 = vector.load %arg3[%c0_3, %c0_4] : memref<1x1024xf32, #tpu.memory_space<vmem>>, vector<1x1024xf32>
    %4 = vector.broadcast %3 : vector<1x1024xf32> to vector<16x1024xf32>
    %5 = arith.addf %2, %4 : vector<16x1024xf32>
    %cst_5 = arith.constant 0.000000e+00 : f32
    %6 = vector.broadcast %cst_5 : f32 to vector<16x1024xf32>
    %7 = arith.maximumf %5, %6 : vector<16x1024xf32>
    %c0_6 = arith.constant 0 : index
    %c0_7 = arith.constant 0 : index
    %8 = vector.load %arg4[%c0_6, %c0_7] : memref<1024x128xf32, #tpu.memory_space<vmem>>, vector<1024x128xf32>
    %cst_8 = arith.constant dense<0.000000e+00> : vector<16x128xf32>
    %9 = tpu.matmul %7, %8, %cst_8 {dimension_numbers = #tpu.dot_dimension_numbers<[1], [0], [0], [1], [0, 0, 1, 1], [], []>} : vector<16x1024xf32>, vector<1024x128xf32>, vector<16x128xf32> -> vector<16x128xf32>
    %c0_9 = arith.constant 0 : index
    %c0_10 = arith.constant 0 : index
    %10 = vector.load %arg5[%c0_9, %c0_10] : memref<1x128xf32, #tpu.memory_space<vmem>>, vector<1x128xf32>
    %11 = vector.broadcast %10 : vector<1x128xf32> to vector<16x128xf32>
    %12 = arith.addf %9, %11 : vector<16x128xf32>
    %c0_11 = arith.constant 0 : index
    %c0_12 = arith.constant 0 : index
    %13 = vector.load %arg6[%c0_11, %c0_12] : memref<16x128xf32, #tpu.memory_space<vmem>>, vector<16x128xf32>
    tpu.vector_store %arg6[%c0_11, %c0_12], %12 {strides = array<i32>} : memref<16x128xf32, #tpu.memory_space<vmem>>, vector<16x128xf32>,
    return
  }
  func.func @transform_0(%arg0: i32) -> (i32, i32) {
    %c0_i32 = arith.constant 0 : i32
    %c0_i32_0 = arith.constant 0 : i32
    return %arg0, %c0_i32 : i32, i32
  }
  func.func @transform_1(%arg0: i32) -> (i32, i32) {
    %c0_i32 = arith.constant 0 : i32
    %c0_i32_0 = arith.constant 0 : i32
    %c0_i32_1 = arith.constant 0 : i32
    return %c0_i32, %c0_i32_0 : i32, i32
  }
  func.func @transform_2(%arg0: i32) -> (i32, i32) {
    %c0_i32 = arith.constant 0 : i32
    %c0_i32_0 = arith.constant 0 : i32
    %c0_i32_1 = arith.constant 0 : i32
    return %c0_i32, %c0_i32_0 : i32, i32
  }
  func.func @transform_3(%arg0: i32) -> (i32, i32) {
    %c0_i32 = arith.constant 0 : i32
    %c0_i32_0 = arith.constant 0 : i32
    %c0_i32_1 = arith.constant 0 : i32
    return %c0_i32, %c0_i32_0 : i32, i32
  }
  func.func @transform_4(%arg0: i32) -> (i32, i32) {
    %c0_i32 = arith.constant 0 : i32
    %c0_i32_0 = arith.constant 0 : i32
    %c0_i32_1 = arith.constant 0 : i32
    return %c0_i32, %c0_i32_0 : i32, i32
  }
  func.func @transform_5(%arg0: i32) -> (i32, i32) {
    %c0_i32 = arith.constant 0 : i32
    %c0_i32_0 = arith.constant 0 : i32
    return %arg0, %c0_i32 : i32, i32
  }
}

</mosaic_0001>

<bundles_post_ra>
// kernel: tpu_custom_call.1
= control target key start
LH: loop header
LB: loop body
LE: loop exit
PB: predicated region body
PF: predicated region fallthrough
CT: control target
= control target key end

     0   :  { %10 = vsyncpa [#allocation3], 0  ;;  %s1420_s0 = inlined_call_operand.hbm [shape: f32[16,128], index: 0, kind: input, shape index: {}]   ;;  %s1421_s1 = inlined_call_operand.hbm [shape: f32[128,1024], index: 1, kind: input, shape index: {}]   ;;  %s1422_s2 = inlined_call_operand.hbm [shape: f32[1,1024], index: 2, kind: input, shape index: {}]   ;;  %s1423_s3 = inlined_call_operand.hbm [shape: f32[1024,128], index: 3, kind: input, shape index: {}]   ;;  %s1424_s4 = inlined_call_operand.vmem [shape: f32[1,128], index: 4, kind: input, shape index: {}]   ;;  %s1425_s5 = inlined_call_operand.hbm [shape: f32[16,128], index: 5, kind: output, shape index: {}]  }
   0x1   :  { %11 = vsyncpa [#allocation6], 0 }
   0x2   :  { %12 = vsyncpa [#allocation9], 0 }
   0x3   :  { %13 = vsyncpa [#allocation4], 0  ;;  %s1297_s18 = smov [#allocation5]  }
   0x4   :  { %s31_s19 = sshll.u32 %s1297_s18, 4  ;;  %s32_s19 = int_to_ptr.vmem [resolvable:$true] %s31_s19 }
   0x5   :  { %s1197_s20 = scalar_lea.vmem %s32_s19, 16384  ;;  %p1202_p1 = scmp.lt.s32.totalorder %s32_s19, %s32_s19 }
   0x6   :  { %p1198_p0 = scmp.ne.s32.totalorder %s32_s19, %s1197_s20  ;;  %p1203_p2 = scmp.lt.s32.totalorder %s1197_s20, %s1197_s20 }
   0x8   :  { %p1204_p3 = por %p1203_p2, %p1202_p1 }
   0xa   :  { %p1205_p4 = pnand %p1204_p3, %p1198_p0 }
   0xc   :  { %1208 = shalt.err (!%p1205_p4)
}
   0xd   :  { %s1298_s21 = smov 1024   ;;  %s1299_s22 = smov 64  }
   0xe   :  { %37 = dma.hbm_to_vmem [thread:$0]  %s1421_s1, 16384, %s32_s19, [#allocation6], %s1298_s21, %s1298_s21, %s1299_s22  }
   0xf   :  { %s1300_s25 = smov [#allocation2]  }
  0x10   :  { %s19_s26 = sshll.u32 %s1300_s25, 4  ;;  %s20_s26 = int_to_ptr.vmem [resolvable:$true] %s19_s26 }
  0x11   :  { %s1217_s27 = scalar_lea.vmem %s20_s26, 256  ;;  %p1222_p6 = scmp.lt.s32.totalorder %s20_s26, %s20_s26 }
  0x12   :  { %p1218_p5 = scmp.ne.s32.totalorder %s20_s26, %s1217_s27  ;;  %p1223_p7 = scmp.lt.s32.totalorder %s1217_s27, %s1217_s27 }
  0x14   :  { %p1224_p8 = por %p1223_p7, %p1222_p6 }
  0x16   :  { %p1225_p9 = pnand %p1224_p8, %p1218_p5 }
  0x18   :  { %1228 = shalt.err (!%p1225_p9)
}
  0x19   :  { %s1301_s28 = smov 128   ;;  %s1302_s29 = smov 8  }
  0x1a   :  { %25 = dma.hbm_to_vmem [thread:$0]  %s1420_s0, 256, %s20_s26, [#allocation3], %s1301_s28, %s1301_s28, %s1302_s29  }
  0x1b   :  { %s1303_s1 = smov [#allocation7]   ;;  %s1304_s8 = smov [#allocation8]  }
  0x1c   :  { %s44_s7 = sshll.u32 %s1303_s1, 4  ;;  %s53_s9 = sshll.u32 %s1304_s8, 4  ;;  %s45_s7 = int_to_ptr.vmem [resolvable:$true] %s44_s7  ;;  %s54_s9 = int_to_ptr.vmem [resolvable:$true] %s53_s9 }
  0x1d   :  { %s1237_s10 = scalar_lea.vmem %s45_s7, 128  ;;  %p1242_p11 = scmp.lt.s32.totalorder %s45_s7, %s45_s7 }
  0x1e   :  { %p1238_p10 = scmp.ne.s32.totalorder %s45_s7, %s1237_s10  ;;  %p1243_p12 = scmp.lt.s32.totalorder %s1237_s10, %s1237_s10 }
  0x20   :  { %p1244_p13 = por %p1243_p12, %p1242_p11 }
  0x22   :  { %p1245_p0 = pnand %p1244_p13, %p1238_p10 }
  0x24   :  { %1248 = shalt.err (!%p1245_p0)
}
  0x25   :  { %47 = dma.hbm_to_vmem [thread:$0]  %s1422_s2, 128, %s45_s7, [#allocation6]  }
  0x26   :  { %s1257_s13 = scalar_lea.vmem %s54_s9, 16384  ;;  %p1262_p2 = scmp.lt.s32.totalorder %s54_s9, %s54_s9 }
  0x27   :  { %p1258_p1 = scmp.ne.s32.totalorder %s54_s9, %s1257_s13  ;;  %p1263_p3 = scmp.lt.s32.totalorder %s1257_s13, %s1257_s13 }
  0x29   :  { %p1264_p4 = por %p1263_p3, %p1262_p2 }
  0x2b   :  { %p1265_p5 = pnand %p1264_p4, %p1258_p1 }
  0x2d   :  { %1268 = shalt.err (!%p1265_p5)
}
  0x2e   :  { %59 = dma.hbm_to_vmem [thread:$0]  %s1423_s3, 16384, %s54_s9, [#allocation9], %s1301_s28, %s1301_s28, %s1302_s29  }
  0x2f   :  { %1289 = dma.done.wait [#allocation3], 256  }
  0x30   :  { %1290 = vsyncadd [#allocation3], 4294967040 }
  0x31   :  { %1291 = dma.done.wait [#allocation6], 16512  }
  0x32   :  { %1292 = vsyncadd [#allocation6], 4294950784 }
  0x33   :  { %1293 = dma.done.wait [#allocation9], 16384  }
  0x34   :  { %1294 = vsyncadd [#allocation9], 4294950912  ;;  %v1305_v0 = vmov 0.0   ;;  %v197_v1 = vld [vmem:[#allocation5 + $0x3c8] sm:$0xff]  ;;  %v199_v2 = vld [vmem:[#allocation5 + $0x3d8] sm:$0xff] }
  0x35   :  { %310 = vmatprep.mubr.f32.mxu0 %v1305_v0  ;;  %387 = vmatprep.mubr.f32.mxu1 %v1305_v0  ;;  %v196_v3 = vld [vmem:[#allocation5 + $0x3c0] sm:$0xff]  ;;  %v198_v4 = vld [vmem:[#allocation5 + $0x3d0] sm:$0xff]  ;;  %v189_v5 = vld [vmem:[#allocation5 + $0x388] sm:$0xff] }
  0x36   :  { %246 = vmatprep.subr.mxu0 %v197_v1  ;;  %323 = vmatprep.subr.mxu1 %v199_v2  ;;  %v191_v6 = vld [vmem:[#allocation5 + $0x398] sm:$0xff]  ;;  %v188_v7 = vld [vmem:[#allocation5 + $0x380] sm:$0xff]  ;;  %v190_v8 = vld [vmem:[#allocation5 + $0x390] sm:$0xff] }
  0x37   :  { %247 = vmatpush1.msra.mxu0 %v196_v3  ;;  %324 = vmatpush1.msra.mxu1 %v198_v4  ;;  %v181_v9 = vld [vmem:[#allocation5 + $0x348] sm:$0xff]  ;;  %v183_v10 = vld [vmem:[#allocation5 + $0x358] sm:$0xff]  ;;  %v180_v11 = vld [vmem:[#allocation5 + $0x340] sm:$0xff] }
  0x38   :  { %248 = vmatprep.subr.mxu0 %v189_v5  ;;  %325 = vmatprep.subr.mxu1 %v191_v6  ;;  %v182_v12 = vld [vmem:[#allocation5 + $0x350] sm:$0xff]  ;;  %v173_v13 = vld [vmem:[#allocation5 + $0x308] sm:$0xff]  ;;  %v175_v14 = vld [vmem:[#allocation5 + $0x318] sm:$0xff] }
  0x39   :  { %249 = vmatpush1.msra.mxu0 %v188_v7  ;;  %326 = vmatpush1.msra.mxu1 %v190_v8  ;;  %v172_v15 = vld [vmem:[#allocation5 + $0x300] sm:$0xff]  ;;  %v174_v16 = vld [vmem:[#allocation5 + $0x310] sm:$0xff]  ;;  %v165_v17 = vld [vmem:[#allocation5 + $0x2c8] sm:$0xff] }
  0x3a   :  { %250 = vmatprep.subr.mxu0 %v181_v9  ;;  %327 = vmatprep.subr.mxu1 %v183_v10  ;;  %v167_v18 = vld [vmem:[#allocation5 + $0x2d8] sm:$0xff]  ;;  %v164_v19 = vld [vmem:[#allocation5 + $0x2c0] sm:$0xff]  ;;  %v166_v20 = vld [vmem:[#allocation5 + $0x2d0] sm:$0xff] }
  0x3b   :  { %251 = vmatpush1.msra.mxu0 %v180_v11  ;;  %328 = vmatpush1.msra.mxu1 %v182_v12  ;;  %v157_v21 = vld [vmem:[#allocation5 + $0x288] sm:$0xff]  ;;  %v159_v22 = vld [vmem:[#allocation5 + $0x298] sm:$0xff]  ;;  %v156_v23 = vld [vmem:[#allocation5 + $0x280] sm:$0xff] }
  0x3c   :  { %252 = vmatprep.subr.mxu0 %v173_v13  ;;  %329 = vmatprep.subr.mxu1 %v175_v14  ;;  %v158_v24 = vld [vmem:[#allocation5 + $0x290] sm:$0xff]  ;;  %v149_v25 = vld [vmem:[#allocation5 + $0x248] sm:$0xff]  ;;  %v151_v26 = vld [vmem:[#allocation5 + $0x258] sm:$0xff] }
  0x3d   :  { %253 = vmatpush1.msra.mxu0 %v172_v15  ;;  %330 = vmatpush1.msra.mxu1 %v174_v16  ;;  %v148_v27 = vld [vmem:[#allocation5 + $0x240] sm:$0xff]  ;;  %v150_v28 = vld [vmem:[#allocation5 + $0x250] sm:$0xff]  ;;  %v141_v29 = vld [vmem:[#allocation5 + $0x208] sm:$0xff] }
  0x3e   :  { %254 = vmatprep.subr.mxu0 %v165_v17  ;;  %331 = vmatprep.subr.mxu1 %v167_v18  ;;  %v143_v30 = vld [vmem:[#allocation5 + $0x218] sm:$0xff]  ;;  %v140_v31 = vld [vmem:[#allocation5 + $0x200] sm:$0xff]  ;;  %v142_v32 = vld [vmem:[#allocation5 + $0x210] sm:$0xff] }
  0x3f   :  { %255 = vmatpush1.msra.mxu0 %v164_v19  ;;  %332 = vmatpush1.msra.mxu1 %v166_v20  ;;  %v133_v33 = vld [vmem:[#allocation5 + $0x1c8] sm:$0xff]  ;;  %v135_v34 = vld [vmem:[#allocation5 + $0x1d8] sm:$0xff]  ;;  %v132_v35 = vld [vmem:[#allocation5 + $0x1c0] sm:$0xff] }
  0x40   :  { %256 = vmatprep.subr.mxu0 %v157_v21  ;;  %333 = vmatprep.subr.mxu1 %v159_v22  ;;  %v134_v36 = vld [vmem:[#allocation5 + $0x1d0] sm:$0xff]  ;;  %v125_v37 = vld [vmem:[#allocation5 + $0x188] sm:$0xff]  ;;  %v127_v38 = vld [vmem:[#allocation5 + $0x198] sm:$0xff] }
  0x41   :  { %257 = vmatpush1.msra.mxu0 %v156_v23  ;;  %334 = vmatpush1.msra.mxu1 %v158_v24  ;;  %v124_v39 = vld [vmem:[#allocation5 + $0x180] sm:$0xff]  ;;  %v126_v40 = vld [vmem:[#allocation5 + $0x190] sm:$0xff]  ;;  %v117_v41 = vld [vmem:[#allocation5 + $0x148] sm:$0xff] }
  0x42   :  { %258 = vmatprep.subr.mxu0 %v149_v25  ;;  %335 = vmatprep.subr.mxu1 %v151_v26  ;;  %v119_v42 = vld [vmem:[#allocation5 + $0x158] sm:$0xff]  ;;  %v116_v43 = vld [vmem:[#allocation5 + $0x140] sm:$0xff]  ;;  %v118_v44 = vld [vmem:[#allocation5 + $0x150] sm:$0xff] }
  0x43   :  { %259 = vmatpush1.msra.mxu0 %v148_v27  ;;  %336 = vmatpush1.msra.mxu1 %v150_v28  ;;  %v109_v45 = vld [vmem:[#allocation5 + $0x108] sm:$0xff]  ;;  %v111_v46 = vld [vmem:[#allocation5 + $0x118] sm:$0xff]  ;;  %v108_v47 = vld [vmem:[#allocation5 + $0x100] sm:$0xff] }
  0x44   :  { %260 = vmatprep.subr.mxu0 %v141_v29  ;;  %337 = vmatprep.subr.mxu1 %v143_v30  ;;  %v110_v48 = vld [vmem:[#allocation5 + $0x110] sm:$0xff]  ;;  %v101_v49 = vld [vmem:[#allocation5 + $0xc8] sm:$0xff]  ;;  %v103_v50 = vld [vmem:[#allocation5 + $0xd8] sm:$0xff] }
  0x45   :  { %261 = vmatpush1.msra.mxu0 %v140_v31  ;;  %338 = vmatpush1.msra.mxu1 %v142_v32  ;;  %v100_v51 = vld [vmem:[#allocation5 + $0xc0] sm:$0xff]  ;;  %v102_v52 = vld [vmem:[#allocation5 + $0xd0] sm:$0xff]  ;;  %v93_v53 = vld [vmem:[#allocation5 + $0x88] sm:$0xff] }
  0x46   :  { %262 = vmatprep.subr.mxu0 %v133_v33  ;;  %339 = vmatprep.subr.mxu1 %v135_v34  ;;  %v95_v54 = vld [vmem:[#allocation5 + $0x98] sm:$0xff]  ;;  %v92_v55 = vld [vmem:[#allocation5 + $0x80] sm:$0xff]  ;;  %v94_v56 = vld [vmem:[#allocation5 + $0x90] sm:$0xff] }
  0x47   :  { %263 = vmatpush1.msra.mxu0 %v132_v35  ;;  %340 = vmatpush1.msra.mxu1 %v134_v36  ;;  %v85_v57 = vld [vmem:[#allocation5 + $0x48] sm:$0xff]  ;;  %v87_v58 = vld [vmem:[#allocation5 + $0x58] sm:$0xff]  ;;  %v84_v59 = vld [vmem:[#allocation5 + $0x40] sm:$0xff] }
  0x48   :  { %264 = vmatprep.subr.mxu0 %v125_v37  ;;  %341 = vmatprep.subr.mxu1 %v127_v38  ;;  %v86_v60 = vld [vmem:[#allocation5 + $0x50] sm:$0xff]  ;;  %v77_v61 = vld [vmem:[#allocation5 + $0x8] sm:$0xff]  ;;  %v79_v62 = vld [vmem:[#allocation5 + $0x18] sm:$0xff] }
  0x49   :  { %265 = vmatpush1.msra.mxu0 %v124_v39  ;;  %342 = vmatpush1.msra.mxu1 %v126_v40  ;;  %v76_v63 = vld [vmem:[#allocation5] sm:$0xff]  ;;  %v78_v1 = vld [vmem:[#allocation5 + $0x10] sm:$0xff]  ;;  %v201_v3 = vld [vmem:[#allocation5 + $0x3e8] sm:$0xff] }
  0x4a   :  { %266 = vmatprep.subr.mxu0 %v117_v41  ;;  %343 = vmatprep.subr.mxu1 %v119_v42  ;;  %v1357_v2 = vld [vmem:[#allocation2] sm:$0xff]  ;;  %v203_v4 = vld [vmem:[#allocation5 + $0x3f8] sm:$0xff]  ;;  %v200_v5 = vld [vmem:[#allocation5 + $0x3e0] sm:$0xff] }
  0x4b   :  { %267 = vmatpush1.msra.mxu0 %v116_v43  ;;  %344 = vmatpush1.msra.mxu1 %v118_v44  ;;  %v202_v6 = vld [vmem:[#allocation5 + $0x3f0] sm:$0xff]  ;;  %v193_v7 = vld [vmem:[#allocation5 + $0x3a8] sm:$0xff]  ;;  %v195_v8 = vld [vmem:[#allocation5 + $0x3b8] sm:$0xff] }
  0x4c   :  { %268 = vmatprep.subr.mxu0 %v109_v45  ;;  %345 = vmatprep.subr.mxu1 %v111_v46  ;;  %v192_v9 = vld [vmem:[#allocation5 + $0x3a0] sm:$0xff]  ;;  %v194_v10 = vld [vmem:[#allocation5 + $0x3b0] sm:$0xff]  ;;  %v185_v11 = vld [vmem:[#allocation5 + $0x368] sm:$0xff] }
  0x4d   :  { %269 = vmatpush1.msra.mxu0 %v108_v47  ;;  %346 = vmatpush1.msra.mxu1 %v110_v48  ;;  %v187_v12 = vld [vmem:[#allocation5 + $0x378] sm:$0xff]  ;;  %v184_v13 = vld [vmem:[#allocation5 + $0x360] sm:$0xff]  ;;  %v186_v14 = vld [vmem:[#allocation5 + $0x370] sm:$0xff] }
  0x4e   :  { %270 = vmatprep.subr.mxu0 %v101_v49  ;;  %347 = vmatprep.subr.mxu1 %v103_v50  ;;  %v177_v15 = vld [vmem:[#allocation5 + $0x328] sm:$0xff]  ;;  %v179_v16 = vld [vmem:[#allocation5 + $0x338] sm:$0xff]  ;;  %v176_v17 = vld [vmem:[#allocation5 + $0x320] sm:$0xff] }
  0x4f   :  { %271 = vmatpush1.msra.mxu0 %v100_v51  ;;  %348 = vmatpush1.msra.mxu1 %v102_v52  ;;  %v178_v18 = vld [vmem:[#allocation5 + $0x330] sm:$0xff]  ;;  %v169_v19 = vld [vmem:[#allocation5 + $0x2e8] sm:$0xff]  ;;  %v171_v20 = vld [vmem:[#allocation5 + $0x2f8] sm:$0xff] }
  0x50   :  { %272 = vmatprep.subr.mxu0 %v93_v53  ;;  %349 = vmatprep.subr.mxu1 %v95_v54  ;;  %v168_v21 = vld [vmem:[#allocation5 + $0x2e0] sm:$0xff]  ;;  %v170_v22 = vld [vmem:[#allocation5 + $0x2f0] sm:$0xff]  ;;  %v161_v23 = vld [vmem:[#allocation5 + $0x2a8] sm:$0xff] }
  0x51   :  { %273 = vmatpush1.msra.mxu0 %v92_v55  ;;  %350 = vmatpush1.msra.mxu1 %v94_v56  ;;  %v163_v24 = vld [vmem:[#allocation5 + $0x2b8] sm:$0xff]  ;;  %v160_v25 = vld [vmem:[#allocation5 + $0x2a0] sm:$0xff]  ;;  %v162_v26 = vld [vmem:[#allocation5 + $0x2b0] sm:$0xff] }
  0x52   :  { %274 = vmatprep.subr.mxu0 %v85_v57  ;;  %351 = vmatprep.subr.mxu1 %v87_v58  ;;  %v153_v27 = vld [vmem:[#allocation5 + $0x268] sm:$0xff]  ;;  %v155_v28 = vld [vmem:[#allocation5 + $0x278] sm:$0xff]  ;;  %v152_v29 = vld [vmem:[#allocation5 + $0x260] sm:$0xff] }
  0x53   :  { %275 = vmatpush1.msra.mxu0 %v84_v59  ;;  %352 = vmatpush1.msra.mxu1 %v86_v60  ;;  %v154_v30 = vld [vmem:[#allocation5 + $0x270] sm:$0xff]  ;;  %v145_v31 = vld [vmem:[#allocation5 + $0x228] sm:$0xff]  ;;  %v147_v32 = vld [vmem:[#allocation5 + $0x238] sm:$0xff] }
  0x54   :  { %276 = vmatprep.subr.mxu0 %v77_v61  ;;  %353 = vmatprep.subr.mxu1 %v79_v62  ;;  %v144_v33 = vld [vmem:[#allocation5 + $0x220] sm:$0xff]  ;;  %v146_v34 = vld [vmem:[#allocation5 + $0x230] sm:$0xff]  ;;  %v137_v35 = vld [vmem:[#allocation5 + $0x1e8] sm:$0xff] }
  0x55   :  { %277 = vmatpush1.msra.mxu0 %v76_v63  ;;  %354 = vmatpush1.msra.mxu1 %v78_v1  ;;  %v139_v36 = vld [vmem:[#allocation5 + $0x1f8] sm:$0xff]  ;;  %v136_v37 = vld [vmem:[#allocation5 + $0x1e0] sm:$0xff]  ;;  %v138_v38 = vld [vmem:[#allocation5 + $0x1f0] sm:$0xff] }
  0x56   :  { %311 = vmatmul.mubr.f32.vlgmr.msra.gmra.mxu0 %v1357_v2  ;;  %388 = vmatmul.mubr.f32.vlgmr.msra.gmra.mxu1 %v1357_v2  ;;  %v129_v39 = vld [vmem:[#allocation5 + $0x1a8] sm:$0xff]  ;;  %v131_v40 = vld [vmem:[#allocation5 + $0x1b8] sm:$0xff]  ;;  %v128_v41 = vld [vmem:[#allocation5 + $0x1a0] sm:$0xff] }
  0x57   :  { %400 = vmatprep.subr.mxu0 %v201_v3  ;;  %477 = vmatprep.subr.mxu1 %v203_v4  ;;  %v130_v42 = vld [vmem:[#allocation5 + $0x1b0] sm:$0xff]  ;;  %v121_v43 = vld [vmem:[#allocation5 + $0x168] sm:$0xff]  ;;  %v123_v44 = vld [vmem:[#allocation5 + $0x178] sm:$0xff] }
  0x58   :  { %401 = vmatpush1.msra.mxu0 %v200_v5  ;;  %478 = vmatpush1.msra.mxu1 %v202_v6  ;;  %v120_v45 = vld [vmem:[#allocation5 + $0x160] sm:$0xff]  ;;  %v122_v46 = vld [vmem:[#allocation5 + $0x170] sm:$0xff]  ;;  %v113_v47 = vld [vmem:[#allocation5 + $0x128] sm:$0xff] }
  0x59   :  { %402 = vmatprep.subr.mxu0 %v193_v7  ;;  %479 = vmatprep.subr.mxu1 %v195_v8  ;;  %v115_v48 = vld [vmem:[#allocation5 + $0x138] sm:$0xff]  ;;  %v112_v50 = vld [vmem:[#allocation5 + $0x120] sm:$0xff]  ;;  %v114_v51 = vld [vmem:[#allocation5 + $0x130] sm:$0xff] }
  0x5a   :  { %403 = vmatpush1.msra.mxu0 %v192_v9  ;;  %480 = vmatpush1.msra.mxu1 %v194_v10  ;;  %v1361_v49 = vld [vmem:[#allocation2 + $0x8] sm:$0xff]  ;;  %v105_v52 = vld [vmem:[#allocation5 + $0xe8] sm:$0xff]  ;;  %v104_v54 = vld [vmem:[#allocation5 + $0xe0] sm:$0xff] }
  0x5b   :  { %404 = vmatprep.subr.mxu0 %v185_v11  ;;  %481 = vmatprep.subr.mxu1 %v187_v12  ;;  %v107_v53 = vld [vmem:[#allocation5 + $0xf8] sm:$0xff]  ;;  %v106_v55 = vld [vmem:[#allocation5 + $0xf0] sm:$0xff]  ;;  %v97_v56 = vld [vmem:[#allocation5 + $0xa8] sm:$0xff] }
  0x5c   :  { %405 = vmatpush1.msra.mxu0 %v184_v13  ;;  %482 = vmatpush1.msra.mxu1 %v186_v14  ;;  %v99_v57 = vld [vmem:[#allocation5 + $0xb8] sm:$0xff]  ;;  %v96_v58 = vld [vmem:[#allocation5 + $0xa0] sm:$0xff]  ;;  %v98_v59 = vld [vmem:[#allocation5 + $0xb0] sm:$0xff] }
  0x5d   :  { %406 = vmatprep.subr.mxu0 %v177_v15  ;;  %483 = vmatprep.subr.mxu1 %v179_v16  ;;  %v89_v60 = vld [vmem:[#allocation5 + $0x68] sm:$0xff]  ;;  %v91_v61 = vld [vmem:[#allocation5 + $0x78] sm:$0xff]  ;;  %v88_v62 = vld [vmem:[#allocation5 + $0x60] sm:$0xff] }
  0x5e   :  { %407 = vmatpush1.msra.mxu0 %v176_v17  ;;  %484 = vmatpush1.msra.mxu1 %v178_v18  ;;  %v90_v63 = vld [vmem:[#allocation5 + $0x70] sm:$0xff]  ;;  %v81_v1 = vld [vmem:[#allocation5 + $0x28] sm:$0xff]  ;;  %v83_v3 = vld [vmem:[#allocation5 + $0x38] sm:$0xff] }
  0x5f   :  { %408 = vmatprep.subr.mxu0 %v169_v19  ;;  %485 = vmatprep.subr.mxu1 %v171_v20  ;;  %v80_v4 = vld [vmem:[#allocation5 + $0x20] sm:$0xff]  ;;  %v82_v5 = vld [vmem:[#allocation5 + $0x30] sm:$0xff]  ;;  %v600_v10 = vld [vmem:[#allocation8 + $0xf0] sm:$0xff] }
  0x60   :  { %409 = vmatpush1.msra.mxu0 %v168_v21  ;;  %486 = vmatpush1.msra.mxu1 %v170_v22  ;;  %v601_v6 = vld [vmem:[#allocation8 + $0xf8] sm:$0xff]  ;;  %v632_v11 = vld [vmem:[#allocation8 + $0x1f0] sm:$0xff]  ;;  %v599_v14 = vld [vmem:[#allocation8 + $0xe8] sm:$0xff] }
  0x61   :  { %410 = vmatprep.subr.mxu0 %v161_v23  ;;  %487 = vmatprep.subr.mxu1 %v163_v24  ;;  %v633_v7 = vld [vmem:[#allocation8 + $0x1f8] sm:$0xff]  ;;  %v584_v12 = vld [vmem:[#allocation8 + $0x70] sm:$0xff]  ;;  %v583_v15 = vld [vmem:[#allocation8 + $0x68] sm:$0xff] }
  0x62   :  { %411 = vmatpush1.msra.mxu0 %v160_v25  ;;  %488 = vmatpush1.msra.mxu1 %v162_v26  ;;  %v585_v8 = vld [vmem:[#allocation8 + $0x78] sm:$0xff]  ;;  %v616_v13 = vld [vmem:[#allocation8 + $0x170] sm:$0xff]  ;;  %v615_v16 = vld [vmem:[#allocation8 + $0x168] sm:$0xff] }
  0x63   :  { %412 = vmatprep.subr.mxu0 %v153_v27  ;;  %489 = vmatprep.subr.mxu1 %v155_v28  ;;  %v617_v9 = vld [vmem:[#allocation8 + $0x178] sm:$0xff]  ;;  %v630_v17 = vld [vmem:[#allocation8 + $0x1e0] sm:$0xff]  ;;  %v596_v24 = vld [vmem:[#allocation8 + $0xd0] sm:$0xff] }
  0x64   :  { %413 = vmatpush1.msra.mxu0 %v152_v29  ;;  %490 = vmatpush1.msra.mxu1 %v154_v30  ;;  %v582_v18 = vld [vmem:[#allocation8 + $0x60] sm:$0xff]  ;;  %v597_v20 = vld [vmem:[#allocation8 + $0xd8] sm:$0xff]  ;;  %v628_v25 = vld [vmem:[#allocation8 + $0x1d0] sm:$0xff] }
  0x65   :  { %414 = vmatprep.subr.mxu0 %v145_v31  ;;  %491 = vmatprep.subr.mxu1 %v147_v32  ;;  %v614_v19 = vld [vmem:[#allocation8 + $0x160] sm:$0xff]  ;;  %v629_v21 = vld [vmem:[#allocation8 + $0x1d8] sm:$0xff]  ;;  %v580_v26 = vld [vmem:[#allocation8 + $0x50] sm:$0xff] }
  0x66   :  { %415 = vmatpush1.msra.mxu0 %v144_v33  ;;  %492 = vmatpush1.msra.mxu1 %v146_v34  ;;  %v581_v22 = vld [vmem:[#allocation8 + $0x58] sm:$0xff]  ;;  %v612_v27 = vld [vmem:[#allocation8 + $0x150] sm:$0xff]  ;;  %v595_v28 = vld [vmem:[#allocation8 + $0xc8] sm:$0xff] }
  0x67   :  { %416 = vmatprep.subr.mxu0 %v137_v35  ;;  %493 = vmatprep.subr.mxu1 %v139_v36  ;;  %v613_v23 = vld [vmem:[#allocation8 + $0x158] sm:$0xff]  ;;  %v627_v29 = vld [vmem:[#allocation8 + $0x1c8] sm:$0xff]  ;;  %v594_v32 = vld [vmem:[#allocation8 + $0xc0] sm:$0xff] }
  0x68   :  { %417 = vmatpush1.msra.mxu0 %v136_v37  ;;  %494 = vmatpush1.msra.mxu1 %v138_v38  ;;  %v579_v30 = vld [vmem:[#allocation8 + $0x48] sm:$0xff]  ;;  %v626_v33 = vld [vmem:[#allocation8 + $0x1c0] sm:$0xff]  ;;  %v593_v36 = vld [vmem:[#allocation8 + $0xb8] sm:$0xff] }
  0x69   :  { %418 = vmatprep.subr.mxu0 %v129_v39  ;;  %495 = vmatprep.subr.mxu1 %v131_v40  ;;  %v611_v31 = vld [vmem:[#allocation8 + $0x148] sm:$0xff]  ;;  %v578_v34 = vld [vmem:[#allocation8 + $0x40] sm:$0xff]  ;;  %v625_v37 = vld [vmem:[#allocation8 + $0x1b8] sm:$0xff] }
  0x6a   :  { %419 = vmatpush1.msra.mxu0 %v128_v41  ;;  %496 = vmatpush1.msra.mxu1 %v130_v42  ;;  %v610_v35 = vld [vmem:[#allocation8 + $0x140] sm:$0xff]  ;;  %v577_v38 = vld [vmem:[#allocation8 + $0x38] sm:$0xff]  ;;  %v592_v40 = vld [vmem:[#allocation8 + $0xb0] sm:$0xff] }
  0x6b   :  { %420 = vmatprep.subr.mxu0 %v121_v43  ;;  %497 = vmatprep.subr.mxu1 %v123_v44  ;;  %v609_v39 = vld [vmem:[#allocation8 + $0x138] sm:$0xff]  ;;  %v624_v41 = vld [vmem:[#allocation8 + $0x1b0] sm:$0xff]  ;;  %v591_v44 = vld [vmem:[#allocation8 + $0xa8] sm:$0xff] }
  0x6c   :  { %421 = vmatpush1.msra.mxu0 %v120_v45  ;;  %498 = vmatpush1.msra.mxu1 %v122_v46  ;;  %v576_v42 = vld [vmem:[#allocation8 + $0x30] sm:$0xff]  ;;  %v623_v45 = vld [vmem:[#allocation8 + $0x1a8] sm:$0xff] }
  0x6d   :  { %316 = vmatprep.mubr.f32.mxu0 %v1305_v0  ;;  %422 = vmatprep.subr.mxu0 %v113_v47  ;;  %v608_v43 = vld [vmem:[#allocation8 + $0x130] sm:$0xff]  ;;  %v575_v46 = vld [vmem:[#allocation8 + $0x28] sm:$0xff] }
  0x6e   :  { %499 = vmatprep.subr.mxu1 %v115_v48  ;;  %317 = vmatmul.mubr.f32.gmra.mxu0 %v1361_v49  ;;  %v607_v47 = vld [vmem:[#allocation8 + $0x128] sm:$0xff]  ;;  %v590_v48 = vld [vmem:[#allocation8 + $0xa0] sm:$0xff] }
  0x6f   :  { %423 = vmatpush1.msra.mxu0 %v112_v50  ;;  %500 = vmatpush1.msra.mxu1 %v114_v51  ;;  %v574_v50 = vld [vmem:[#allocation8 + $0x20] sm:$0xff] }
  0x70   :  { %393 = vmatprep.mubr.f32.mxu1 %v1305_v0  ;;  %424 = vmatprep.subr.mxu0 %v105_v52  ;;  %v606_v51 = vld [vmem:[#allocation8 + $0x120] sm:$0xff]  ;;  %v589_v52 = vld [vmem:[#allocation8 + $0x98] sm:$0xff] }
  0x71   :  { %501 = vmatprep.subr.mxu1 %v107_v53  ;;  %394 = vmatmul.mubr.f32.gmra.mxu1 %v1361_v49  ;;  %v621_v53 = vld [vmem:[#allocation8 + $0x198] sm:$0xff] }
  0x72   :  { %425 = vmatpush1.msra.mxu0 %v104_v54  ;;  %502 = vmatpush1.msra.mxu1 %v106_v55  ;;  %v573_v54 = vld [vmem:[#allocation8 + $0x18] sm:$0xff] }
  0x73   :  { %426 = vmatprep.subr.mxu0 %v97_v56  ;;  %503 = vmatprep.subr.mxu1 %v99_v57  ;;  %v605_v55 = vld [vmem:[#allocation8 + $0x118] sm:$0xff]  ;;  %v588_v56 = vld [vmem:[#allocation8 + $0x90] sm:$0xff] }
  0x74   :  { %427 = vmatpush1.msra.mxu0 %v96_v58  ;;  %504 = vmatpush1.msra.mxu1 %v98_v59  ;;  %v620_v57 = vld [vmem:[#allocation8 + $0x190] sm:$0xff] }
  0x75   :  { %428 = vmatprep.subr.mxu0 %v89_v60  ;;  %505 = vmatprep.subr.mxu1 %v91_v61  ;;  %v572_v58 = vld [vmem:[#allocation8 + $0x10] sm:$0xff]  ;;  %v587_v60 = vld [vmem:[#allocation8 + $0x88] sm:$0xff] }
  0x76   :  { %429 = vmatpush1.msra.mxu0 %v88_v62  ;;  %506 = vmatpush1.msra.mxu1 %v90_v63  ;;  %v604_v59 = vld [vmem:[#allocation8 + $0x110] sm:$0xff]  ;;  %v619_v61 = vld [vmem:[#allocation8 + $0x188] sm:$0xff] }
  0x77   :  { %430 = vmatprep.subr.mxu0 %v81_v1  ;;  %507 = vmatprep.subr.mxu1 %v83_v3  ;;  %v571_v62 = vld [vmem:[#allocation8 + $0x8] sm:$0xff]  ;;  %v586_v1 = vld [vmem:[#allocation8 + $0x80] sm:$0xff] }
  0x78   :  { %431 = vmatpush1.msra.mxu0 %v80_v4  ;;  %464 = vmatprep.mubr.f32.mxu0 %v1305_v0  ;;  %v603_v63 = vld [vmem:[#allocation8 + $0x108] sm:$0xff]  ;;  %v618_v3 = vld [vmem:[#allocation8 + $0x180] sm:$0xff] }
  0x79   :  { %508 = vmatpush1.msra.mxu1 %v82_v5  ;;  %541 = vmatprep.mubr.f32.mxu1 %v1305_v0  ;;  %v570_v4 = vld [vmem:[#allocation8] sm:$0xff] }
  0x7a   :  { %465 = vmatmul.mubr.f32.vlgmr.msra.gmra.mxu0 %v1357_v2  ;;  %542 = vmatmul.mubr.f32.vlgmr.msra.gmra.mxu1 %v1357_v2  ;;  %v631_v2 = vld [vmem:[#allocation8 + $0x1e8] sm:$0xff]  ;;  %v602_v5 = vld [vmem:[#allocation8 + $0x100] sm:$0xff] }
  0x7b   :  { %470 = vmatprep.mubr.f32.mxu0 %v1305_v0  ;;  %547 = vmatprep.mubr.f32.mxu1 %v1305_v0  ;;  %v598_v0 = vld [vmem:[#allocation8 + $0xe0] sm:$0xff] }
  0x7c   :  { %1027 = vmatprep.subr.mxu0 %v601_v6  ;;  %1065 = vmatprep.subr.mxu1 %v633_v7  ;;  %v665_v6 = vld [vmem:[#allocation8 + $0x2f8] sm:$0xff] }
  0x7d   :  { %1028 = vmatpush3.msra.mxu0 %v585_v8  ;;  %1066 = vmatpush3.msra.mxu1 %v617_v9  ;;  %v697_v7 = vld [vmem:[#allocation8 + $0x3f8] sm:$0xff]  ;;  %v206_v8 = vlaneseq }
  0x7e   :  { %471 = vmatmul.mubr.f32.gmra.mxu0 %v1361_v49  ;;  %548 = vmatmul.mubr.f32.gmra.mxu1 %v1361_v49  ;;  %v622_v49 = vld [vmem:[#allocation8 + $0x1a0] sm:$0xff] }
  0x7f   :  { %1029 = vmatprep.subr.mxu0 %v600_v10  ;;  %1067 = vmatprep.subr.mxu1 %v632_v11  ;;  %v1375_v9 = vshrl.u32 %v206_v8, 7  ;;  %v687_v8 = vld [vmem:[#allocation8 + $0x3a8] sm:$0xff] }
  0x80   :  { %1030 = vmatpush3.msra.mxu0 %v584_v12  ;;  %1068 = vmatpush3.msra.mxu1 %v616_v13  ;;  %v1379_v12 = vld [vmem:[#allocation7] sm:$0xff] }
  0x81   :  { %1031 = vmatprep.subr.mxu0 %v599_v14  ;;  %1069 = vmatprep.subr.mxu1 %v631_v2  ;;  %v216_v10 = vsub.s32 2, %v1375_v9  ;;  %v208_v11 = vsub.s32 0, %v1375_v9  ;;  %v212_v13 = vsub.s32 1, %v1375_v9  ;;  %v220_v14 = vsub.s32 3, %v1375_v9 }
  0x82   :  { %1032 = vmatpush3.msra.mxu0 %v583_v15  ;;  %1070 = vmatpush3.msra.mxu1 %v615_v16 }
  0x83   :  { %1033 = vmatprep.subr.mxu0 %v598_v0  ;;  %1071 = vmatprep.subr.mxu1 %v630_v17  ;;  %v1384_v2 = vrot.slane %v1379_v12, %v216_v10  ;;  %v1387_v15 = vrot.slane %v1379_v12, %v208_v11  ;;  %v1390_v16 = vrot.slane %v1379_v12, %v212_v13  ;;  %v639_v11 = vld [vmem:[#allocation8 + $0x228] sm:$0xff] }
  0x84   :  { %1034 = vmatpush3.msra.mxu0 %v582_v18  ;;  %1072 = vmatpush3.msra.mxu1 %v614_v19  ;;  %v1393_v0 = vrot.slane %v1379_v12, %v220_v14  ;;  %v671_v13 = vld [vmem:[#allocation8 + $0x328] sm:$0xff] }
  0x85   :  { %1035 = vmatprep.subr.mxu0 %v597_v20  ;;  %1073 = vmatprep.subr.mxu1 %v629_v21 }
  0x86   :  { %1036 = vmatpush3.msra.mxu0 %v581_v22  ;;  %1074 = vmatpush3.msra.mxu1 %v613_v23 }
  0x87   :  { %1037 = vmatprep.subr.mxu0 %v596_v24  ;;  %1075 = vmatprep.subr.mxu1 %v628_v25 }
  0x88   :  { %1038 = vmatpush3.msra.mxu0 %v580_v26  ;;  %1076 = vmatpush3.msra.mxu1 %v612_v27 }
  0x89   :  { %1039 = vmatprep.subr.mxu0 %v595_v28  ;;  %1077 = vmatprep.subr.mxu1 %v627_v29  ;;  %v649_v29 = vld [vmem:[#allocation8 + $0x278] sm:$0xff] }
  0x8a   :  { %1040 = vmatpush3.msra.mxu0 %v579_v30  ;;  %1078 = vmatpush3.msra.mxu1 %v611_v31  ;;  %v681_v30 = vld [vmem:[#allocation8 + $0x378] sm:$0xff]  ;;  %v664_v31 = vld [vmem:[#allocation8 + $0x2f0] sm:$0xff] }
  0x8b   :  { %1041 = vmatprep.subr.mxu0 %v594_v32  ;;  %1079 = vmatprep.subr.mxu1 %v626_v33  ;;  %v696_v32 = vld [vmem:[#allocation8 + $0x3f0] sm:$0xff] }
  0x8c   :  { %1042 = vmatpush3.msra.mxu0 %v578_v34  ;;  %1080 = vmatpush3.msra.mxu1 %v610_v35  ;;  %v648_v33 = vld [vmem:[#allocation8 + $0x270] sm:$0xff]  ;;  %v663_v35 = vld [vmem:[#allocation8 + $0x2e8] sm:$0xff] }
  0x8d   :  { %1043 = vmatprep.subr.mxu0 %v593_v36  ;;  %1081 = vmatprep.subr.mxu1 %v625_v37  ;;  %v680_v34 = vld [vmem:[#allocation8 + $0x370] sm:$0xff]  ;;  %v695_v36 = vld [vmem:[#allocation8 + $0x3e8] sm:$0xff] }
  0x8e   :  { %1044 = vmatpush3.msra.mxu0 %v577_v38  ;;  %1082 = vmatpush3.msra.mxu1 %v609_v39  ;;  %v647_v37 = vld [vmem:[#allocation8 + $0x268] sm:$0xff]  ;;  %v662_v39 = vld [vmem:[#allocation8 + $0x2e0] sm:$0xff] }
  0x8f   :  { %1045 = vmatprep.subr.mxu0 %v592_v40  ;;  %1083 = vmatprep.subr.mxu1 %v624_v41  ;;  %v679_v38 = vld [vmem:[#allocation8 + $0x368] sm:$0xff]  ;;  %v694_v40 = vld [vmem:[#allocation8 + $0x3e0] sm:$0xff] }
  0x90   :  { %1046 = vmatpush3.msra.mxu0 %v576_v42  ;;  %1084 = vmatpush3.msra.mxu1 %v608_v43  ;;  %v646_v41 = vld [vmem:[#allocation8 + $0x260] sm:$0xff]  ;;  %v661_v43 = vld [vmem:[#allocation8 + $0x2d8] sm:$0xff] }
  0x91   :  { %1047 = vmatprep.subr.mxu0 %v591_v44  ;;  %1085 = vmatprep.subr.mxu1 %v623_v45  ;;  %v678_v42 = vld [vmem:[#allocation8 + $0x360] sm:$0xff]  ;;  %v693_v44 = vld [vmem:[#allocation8 + $0x3d8] sm:$0xff] }
  0x92   :  { %1048 = vmatpush3.msra.mxu0 %v575_v46  ;;  %1086 = vmatpush3.msra.mxu1 %v607_v47  ;;  %v645_v45 = vld [vmem:[#allocation8 + $0x258] sm:$0xff]  ;;  %v660_v47 = vld [vmem:[#allocation8 + $0x2d0] sm:$0xff] }
  0x93   :  { %1049 = vmatprep.subr.mxu0 %v590_v48  ;;  %1087 = vmatprep.subr.mxu1 %v622_v49  ;;  %v677_v46 = vld [vmem:[#allocation8 + $0x358] sm:$0xff]  ;;  %v692_v48 = vld [vmem:[#allocation8 + $0x3d0] sm:$0xff] }
  0x94   :  { %1050 = vmatpush3.msra.mxu0 %v574_v50  ;;  %1088 = vmatpush3.msra.mxu1 %v606_v51  ;;  %v644_v49 = vld [vmem:[#allocation8 + $0x250] sm:$0xff]  ;;  %v659_v51 = vld [vmem:[#allocation8 + $0x2c8] sm:$0xff] }
  0x95   :  { %1051 = vmatprep.subr.mxu0 %v589_v52  ;;  %1089 = vmatprep.subr.mxu1 %v621_v53  ;;  %v676_v50 = vld [vmem:[#allocation8 + $0x350] sm:$0xff]  ;;  %v691_v52 = vld [vmem:[#allocation8 + $0x3c8] sm:$0xff] }
  0x96   :  { %1052 = vmatpush3.msra.mxu0 %v573_v54  ;;  %1090 = vmatpush3.msra.mxu1 %v605_v55  ;;  %v643_v53 = vld [vmem:[#allocation8 + $0x248] sm:$0xff]  ;;  %v658_v55 = vld [vmem:[#allocation8 + $0x2c0] sm:$0xff] }
  0x97   :  { %1053 = vmatprep.subr.mxu0 %v588_v56  ;;  %1091 = vmatprep.subr.mxu1 %v620_v57  ;;  %v675_v54 = vld [vmem:[#allocation8 + $0x348] sm:$0xff]  ;;  %v690_v56 = vld [vmem:[#allocation8 + $0x3c0] sm:$0xff] }
  0x98   :  { %1054 = vmatpush3.msra.mxu0 %v572_v58  ;;  %1092 = vmatpush3.msra.mxu1 %v604_v59  ;;  %v642_v57 = vld [vmem:[#allocation8 + $0x240] sm:$0xff]  ;;  %v657_v59 = vld [vmem:[#allocation8 + $0x2b8] sm:$0xff] }
  0x99   :  { %1055 = vmatprep.subr.mxu0 %v587_v60  ;;  %1093 = vmatprep.subr.mxu1 %v619_v61  ;;  %v674_v58 = vld [vmem:[#allocation8 + $0x340] sm:$0xff]  ;;  %v689_v60 = vld [vmem:[#allocation8 + $0x3b8] sm:$0xff] }
  0x9a   :  { %1056 = vmatpush3.msra.mxu0 %v571_v62  ;;  %1094 = vmatpush3.msra.mxu1 %v603_v63  ;;  %v641_v61 = vld [vmem:[#allocation8 + $0x238] sm:$0xff]  ;;  %v656_v63 = vld [vmem:[#allocation8 + $0x2b0] sm:$0xff] }
  0x9b   :  { %1057 = vmatprep.subr.mxu0 %v586_v1  ;;  %1095 = vmatprep.subr.mxu1 %v618_v3  ;;  %v673_v62 = vld [vmem:[#allocation8 + $0x338] sm:$0xff]  ;;  %v688_v1 = vld [vmem:[#allocation8 + $0x3b0] sm:$0xff] }
  0x9c   :  { %1058 = vmatpush3.msra.mxu0 %v570_v4  ;;  %1096 = vmatpush3.msra.mxu1 %v602_v5  ;;  %v640_v4 = vld [vmem:[#allocation8 + $0x230] sm:$0xff] }
  0x9d   :  { %1103 = vmatprep.subr.mxu0 %v665_v6  ;;  %1141 = vmatprep.subr.mxu1 %v697_v7  ;;  %v672_v5 = vld [vmem:[#allocation8 + $0x330] sm:$0xff]  ;;  %v655_v7 = vld [vmem:[#allocation8 + $0x2a8] sm:$0xff] }
 0x116   :  { %v312_v17 = vpop.f32.mrf.mxu0  ;;  %v389_v18 = vpop.f32.mrf.mxu1 }
 0x117   :  { %v390_v19 = vadd.f32 %v389_v18, %v1384_v2  ;;  %v313_v20 = vadd.f32 %v312_v17, %v1387_v15  ;;  %v654_v18 = vld [vmem:[#allocation8 + $0x2a0] sm:$0xff] }
 0x118   :  { %v314_v21 = vpop.f32.mrf.mxu0  ;;  %v391_v22 = vpop.f32.mrf.mxu1 }
 0x119   :  { %v315_v23 = vadd.f32 %v314_v21, %v1390_v16  ;;  %v392_v24 = vadd.f32 %v391_v22, %v1393_v0  ;;  %v556_v25 = vmax.f32 %v390_v19, 0.0  ;;  %v554_v28 = vmax.f32 %v313_v20, 0.0  ;;  %v686_v19 = vld [vmem:[#allocation8 + $0x3a0] sm:$0xff] }
 0x11b   :  { %v555_v26 = vmax.f32 %v315_v23, 0.0  ;;  %v557_v27 = vmax.f32 %v392_v24, 0.0  ;;  %v670_v24 = vld [vmem:[#allocation8 + $0x320] sm:$0xff] }
 0x11d   :  { %769 = vmatprep.mubr.f32.mxu0 %v555_v26  ;;  %844 = vmatprep.mubr.f32.mxu1 %v557_v27  ;;  %v224_v26 = vsub.s32 4, %v1375_v9  ;;  %v653_v27 = vld [vmem:[#allocation8 + $0x298] sm:$0xff] }
 0x11e   :  { %770 = vmatmul.mubr.f32.vlgmr.msra.gmra.mxu0 %v554_v28  ;;  %845 = vmatmul.mubr.f32.vlgmr.msra.gmra.mxu1 %v556_v25  ;;  %v232_v25 = vsub.s32 6, %v1375_v9  ;;  %v685_v28 = vld [vmem:[#allocation8 + $0x398] sm:$0xff] }
 0x11f   :  { %1104 = vmatpush3.msra.mxu0 %v649_v29  ;;  %1142 = vmatpush3.msra.mxu1 %v681_v30  ;;  %v228_v30 = vsub.s32 5, %v1375_v9 }
 0x120   :  { %1105 = vmatprep.subr.mxu0 %v664_v31  ;;  %1143 = vmatprep.subr.mxu1 %v696_v32  ;;  %v236_v31 = vsub.s32 7, %v1375_v9 }
 0x121   :  { %1106 = vmatpush3.msra.mxu0 %v648_v33  ;;  %1144 = vmatpush3.msra.mxu1 %v680_v34  ;;  %v652_v33 = vld [vmem:[#allocation8 + $0x290] sm:$0xff]  ;;  %v669_v34 = vld [vmem:[#allocation8 + $0x318] sm:$0xff] }
 0x122   :  { %1107 = vmatprep.subr.mxu0 %v663_v35  ;;  %1145 = vmatprep.subr.mxu1 %v695_v36  ;;  %v636_v35 = vld [vmem:[#allocation8 + $0x210] sm:$0xff]  ;;  %v225_v36 = vrot.slane %v1379_v12, %v224_v26  ;;  %v237_v9 = vrot.slane %v1379_v12, %v236_v31 }
 0x123   :  { %1108 = vmatpush3.msra.mxu0 %v647_v37  ;;  %1146 = vmatpush3.msra.mxu1 %v679_v38  ;;  %v684_v37 = vld [vmem:[#allocation8 + $0x390] sm:$0xff]  ;;  %v651_v38 = vld [vmem:[#allocation8 + $0x288] sm:$0xff] }
 0x124   :  { %1109 = vmatprep.subr.mxu0 %v662_v39  ;;  %1147 = vmatprep.subr.mxu1 %v694_v40  ;;  %v229_v39 = vrot.slane %v1379_v12, %v228_v30  ;;  %v668_v40 = vld [vmem:[#allocation8 + $0x310] sm:$0xff] }
 0x125   :  { %1110 = vmatpush3.msra.mxu0 %v646_v41  ;;  %1148 = vmatpush3.msra.mxu1 %v678_v42  ;;  %v635_v41 = vld [vmem:[#allocation8 + $0x208] sm:$0xff] }
 0x126   :  { %1111 = vmatprep.subr.mxu0 %v661_v43  ;;  %1149 = vmatprep.subr.mxu1 %v693_v44  ;;  %v683_v44 = vld [vmem:[#allocation8 + $0x388] sm:$0xff] }
 0x127   :  { %1112 = vmatpush3.msra.mxu0 %v645_v45  ;;  %1150 = vmatpush3.msra.mxu1 %v677_v46  ;;  %v650_v45 = vld [vmem:[#allocation8 + $0x280] sm:$0xff] }
 0x128   :  { %1113 = vmatprep.subr.mxu0 %v660_v47  ;;  %1151 = vmatprep.subr.mxu1 %v692_v48  ;;  %v667_v47 = vld [vmem:[#allocation8 + $0x308] sm:$0xff]  ;;  %v634_v48 = vld [vmem:[#allocation8 + $0x200] sm:$0xff] }
 0x129   :  { %1114 = vmatpush3.msra.mxu0 %v644_v49  ;;  %1152 = vmatpush3.msra.mxu1 %v676_v50 }
 0x12a   :  { %1115 = vmatprep.subr.mxu0 %v659_v51  ;;  %1153 = vmatprep.subr.mxu1 %v691_v52 }
 0x12b   :  { %1116 = vmatpush3.msra.mxu0 %v643_v53  ;;  %1154 = vmatpush3.msra.mxu1 %v675_v54  ;;  %v666_v54 = vld [vmem:[#allocation8 + $0x300] sm:$0xff] }
 0x12c   :  { %1117 = vmatprep.subr.mxu0 %v658_v55  ;;  %1155 = vmatprep.subr.mxu1 %v690_v56 }
 0x12d   :  { %1118 = vmatpush3.msra.mxu0 %v642_v57  ;;  %1156 = vmatpush3.msra.mxu1 %v674_v58 }
 0x12e   :  { %v318_v3 = vpop.f32.mrf.mxu0  ;;  %1119 = vmatprep.subr.mxu0 %v657_v59  ;;  %1157 = vmatprep.subr.mxu1 %v689_v60 }
 0x12f   :  { %v319_v6 = vadd.f32 %v318_v3, %v1387_v15  ;;  %1120 = vmatpush3.msra.mxu0 %v641_v61  ;;  %1158 = vmatpush3.msra.mxu1 %v673_v62  ;;  %v638_v15 = vld [vmem:[#allocation8 + $0x220] sm:$0xff] }
 0x130   :  { %v320_v10 = vpop.f32.mrf.mxu0  ;;  %1121 = vmatprep.subr.mxu0 %v656_v63  ;;  %1159 = vmatprep.subr.mxu1 %v688_v1 }
 0x131   :  { %v321_v14 = vadd.f32 %v320_v10, %v1390_v16  ;;  %v395_v17 = vpop.f32.mrf.mxu1  ;;  %1122 = vmatpush3.msra.mxu0 %v640_v4  ;;  %1160 = vmatpush3.msra.mxu1 %v672_v5  ;;  %v562_v20 = vmax.f32 %v319_v6, 0.0 }
 0x132   :  { %v396_v21 = vadd.f32 %v395_v17, %v1384_v2  ;;  %1123 = vmatprep.subr.mxu0 %v655_v7  ;;  %1161 = vmatprep.subr.mxu1 %v687_v8  ;;  %v637_v2 = vld [vmem:[#allocation8 + $0x218] sm:$0xff] }
 0x133   :  { %v563_v22 = vmax.f32 %v321_v14, 0.0  ;;  %v397_v23 = vpop.f32.mrf.mxu1  ;;  %1124 = vmatpush3.msra.mxu0 %v639_v11  ;;  %1162 = vmatpush3.msra.mxu1 %v671_v13 }
 0x134   :  { %v398_v16 = vadd.f32 %v397_v23, %v1393_v0  ;;  %1125 = vmatprep.subr.mxu0 %v654_v18  ;;  %1163 = vmatprep.subr.mxu1 %v686_v19  ;;  %v564_v29 = vmax.f32 %v396_v21, 0.0  ;;  %v233_v0 = vrot.slane %v1379_v12, %v232_v25  ;;  %v682_v12 = vld [vmem:[#allocation8 + $0x380] sm:$0xff] }
 0x135   :  { %774 = vmatprep.mubr.f32.mxu0 %v563_v22  ;;  %1126 = vmatpush3.msra.mxu0 %v638_v15 }
 0x136   :  { %v565_v32 = vmax.f32 %v398_v16, 0.0  ;;  %775 = vmatmul.mubr.f32.gmra.mxu0 %v562_v20  ;;  %1164 = vmatpush3.msra.mxu1 %v670_v24  ;;  %v1026_v20 = vld [vmem:[%s1424_s4] ss:$0 sm:$0xff]  ;;  %s1306_s4 = smov [#allocation10]  }
 0x137   :  { %1127 = vmatprep.subr.mxu0 %v653_v27  ;;  %1165 = vmatprep.subr.mxu1 %v685_v28  ;;  %s1012_s15 = sshll.u32 %s1306_s4, 4  ;;  %s1013_s15 = int_to_ptr.vmem [resolvable:$true] %s1012_s15 }
 0x138   :  { %849 = vmatprep.mubr.f32.mxu1 %v565_v32  ;;  %1128 = vmatpush3.msra.mxu0 %v637_v2  ;;  %s1269_s16 = scalar_lea.vmem %s1013_s15, 256  ;;  %p1274_p7 = scmp.lt.s32.totalorder %s1013_s15, %s1013_s15 }
 0x139   :  { %850 = vmatmul.mubr.f32.gmra.mxu1 %v564_v29  ;;  %1129 = vmatprep.subr.mxu0 %v652_v33  ;;  %p1270_p6 = scmp.ne.s32.totalorder %s1013_s15, %s1269_s16  ;;  %p1275_p8 = scmp.lt.s32.totalorder %s1269_s16, %s1269_s16 }
 0x13a   :  { %v466_v42 = vpop.f32.mrf.mxu0  ;;  %v543_v43 = vpop.f32.mrf.mxu1  ;;  %1166 = vmatpush3.msra.mxu1 %v669_v34  ;;  %1130 = vmatpush3.msra.mxu0 %v636_v35 }
 0x13b   :  { %v544_v46 = vadd.f32 %v543_v43, %v233_v0  ;;  %1167 = vmatprep.subr.mxu1 %v684_v37  ;;  %1131 = vmatprep.subr.mxu0 %v651_v38  ;;  %v467_v49 = vadd.f32 %v466_v42, %v225_v36  ;;  %p1276_p9 = por %p1275_p8, %p1274_p7 }
 0x13c   :  { %v468_v50 = vpop.f32.mrf.mxu0  ;;  %v545_v51 = vpop.f32.mrf.mxu1  ;;  %1168 = vmatpush3.msra.mxu1 %v668_v40  ;;  %1132 = vmatpush3.msra.mxu0 %v635_v41 }
 0x13d   :  { %v469_v52 = vadd.f32 %v468_v50, %v229_v39  ;;  %v546_v53 = vadd.f32 %v545_v51, %v237_v9  ;;  %1169 = vmatprep.subr.mxu1 %v683_v44  ;;  %1133 = vmatprep.subr.mxu0 %v650_v45  ;;  %v560_v55 = vmax.f32 %v544_v46, 0.0  ;;  %v558_v61 = vmax.f32 %v467_v49, 0.0  ;;  %p1277_p10 = pnand %p1276_p9, %p1270_p6 }
 0x13e   :  { %v472_v56 = vpop.f32.mrf.mxu0  ;;  %v549_v57 = vpop.f32.mrf.mxu1  ;;  %1170 = vmatpush3.msra.mxu1 %v667_v47  ;;  %1134 = vmatpush3.msra.mxu0 %v634_v48 }
 0x13f   :  { %v559_v58 = vmax.f32 %v469_v52, 0.0  ;;  %v561_v59 = vmax.f32 %v546_v53, 0.0  ;;  %v550_v60 = vadd.f32 %v549_v57, %v233_v0  ;;  %1171 = vmatprep.subr.mxu1 %v682_v12  ;;  %v473_v62 = vadd.f32 %v472_v56, %v225_v36 }
 0x140   :  { %v474_v63 = vpop.f32.mrf.mxu0  ;;  %v551_v1 = vpop.f32.mrf.mxu1  ;;  %1172 = vmatpush3.msra.mxu1 %v666_v54 }
 0x141   :  { %v475_v3 = vadd.f32 %v474_v63, %v229_v39  ;;  %v552_v4 = vadd.f32 %v551_v1, %v237_v9  ;;  %919 = vmatprep.mubr.f32.mxu0 %v559_v58  ;;  %994 = vmatprep.mubr.f32.mxu1 %v561_v59  ;;  %v568_v5 = vmax.f32 %v550_v60, 0.0  ;;  %v566_v8 = vmax.f32 %v473_v62, 0.0 }
 0x142   :  { %920 = vmatmul.mubr.f32.vlgmr.msra.gmra.mxu0 %v558_v61  ;;  %995 = vmatmul.mubr.f32.vlgmr.msra.gmra.mxu1 %v560_v55 }
 0x143   :  { %v567_v6 = vmax.f32 %v475_v3, 0.0  ;;  %v569_v7 = vmax.f32 %v552_v4, 0.0 }
 0x145   :  { %924 = vmatprep.mubr.f32.mxu0 %v567_v6  ;;  %999 = vmatprep.mubr.f32.mxu1 %v569_v7 }
 0x146   :  { %925 = vmatmul.mubr.f32.gmra.mxu0 %v566_v8  ;;  %1000 = vmatmul.mubr.f32.gmra.mxu1 %v568_v5 }
 0x1de   :  { %v1059_v10 = vpop.f32.mrf.mxu0  ;;  %v1097_v11 = vpop.f32.mrf.mxu1 }
 0x1e0   :  { %v1060_v13 = vpop.f32.mrf.mxu0  ;;  %v1098_v14 = vpop.f32.mrf.mxu1 }
 0x1e1   :  { %v1061_v19 = vadd.f32 %v1060_v13, %v1059_v10  ;;  %v1099_v16 = vadd.f32 %v1098_v14, %v1097_v11 }
 0x1e3   :  { %v772_v22 = vadd.f32 %v1061_v19, %v1026_v20 }
 0x1e5   :  { %v847_v28 = vadd.f32 %v1099_v16, %v772_v22 }
 0x1f6   :  { %v1062_v17 = vpop.f32.mrf.mxu0 }
 0x1f8   :  { %v1063_v21 = vpop.f32.mrf.mxu0 }
 0x1f9   :  { %v1100_v18 = vpop.f32.mrf.mxu1  ;;  %v1064_v23 = vadd.f32 %v1063_v21, %v1062_v17 }
 0x1fb   :  { %v1101_v15 = vpop.f32.mrf.mxu1  ;;  %v777_v29 = vadd.f32 %v1064_v23, %v1026_v20 }
 0x1fc   :  { %v1102_v2 = vadd.f32 %v1101_v15, %v1100_v18 }
 0x1fe   :  { %v852_v36 = vadd.f32 %v1102_v2, %v777_v29 }
 0x202   :  { %v1135_v24 = vpop.f32.mrf.mxu0  ;;  %v1173_v25 = vpop.f32.mrf.mxu1 }
 0x204   :  { %v1136_v26 = vpop.f32.mrf.mxu0  ;;  %v1174_v27 = vpop.f32.mrf.mxu1 }
 0x205   :  { %v1137_v30 = vadd.f32 %v1136_v26, %v1135_v24  ;;  %v1175_v0 = vadd.f32 %v1174_v27, %v1173_v25 }
 0x206   :  { %v1138_v31 = vpop.f32.mrf.mxu0  ;;  %v1176_v32 = vpop.f32.mrf.mxu1 }
 0x207   :  { %v922_v33 = vadd.f32 %v1137_v30, %v847_v28 }
 0x208   :  { %v1139_v34 = vpop.f32.mrf.mxu0  ;;  %v1177_v35 = vpop.f32.mrf.mxu1 }
 0x209   :  { %v997_v37 = vadd.f32 %v1175_v0, %v922_v33  ;;  %v1140_v38 = vadd.f32 %v1139_v34, %v1138_v31  ;;  %v1178_v9 = vadd.f32 %v1177_v35, %v1176_v32 }
 0x20b   :  { %1005 = vst [vmem:[#allocation10] sm:$0xff] %v997_v37  ;;  %v927_v39 = vadd.f32 %v1140_v38, %v852_v36 }
 0x20d   :  { %v1002_v40 = vadd.f32 %v1178_v9, %v927_v39 }
 0x20f   :  { %1006 = vst [vmem:[#allocation10 + $0x8] sm:$0xff] %v1002_v40 }
 0x210   :  { %1280 = shalt.err (!%p1277_p10)
}
 0x211   :  { %1018 = dma.vmem_to_hbm [thread:$0]  %s1013_s15, 256, %s1425_s5, [#allocation4], %s1301_s28, %s1301_s28, %s1302_s29  }
 0x212   :  { %1295 = dma.done.wait [#allocation4], 256  }
 0x213   :  { %1296 = vsyncadd [#allocation4], 4294967040 }
 0x214   :  { %1022 = vsyncpa [#allocation3], 1 }
 0x215   :  { %1023 = vsyncpa [#allocation6], 1 }
 0x216   :  { %1024 = vsyncpa [#allocation9], 1 }
 0x217   :  { %1025 = vsyncpa [#allocation4], 1 }

</bundles_post_ra>
